<compile_context>
chip_gen: v5e
topology: v5e:2x2
jax: 0.10.0
libtpu: 0.0.40
codegen_flags: <defaults>
</compile_context>

<pallas_src>
import functools

import jax
import jax.numpy as jnp
from jax import lax
from jax.experimental import pallas as pl
from jax.experimental.pallas import tpu as pltpu

_NEG = -1e30  # "minus infinity" that stays NaN-free through exp()


def _round_up(x, m):
    return (x + m - 1) // m * m


def _supcon_tile_kernel(cnt_ref, labq_ref, labk_ref, q_ref, kt_ref, out_ref,
                        m_ref, l_ref, a_ref, *,
                        tq, tk, n_valid, m_valid, pad_exists,
                        normalized, max_logit, loss_scale):
    qi = pl.program_id(0)
    ki = pl.program_id(1)
    last_k = pl.num_programs(1) - 1

    @pl.when(ki == 0)
    def _init():
        if not normalized:
            m_ref[...] = jnp.full_like(m_ref, _NEG)
        l_ref[...] = jnp.zeros_like(l_ref)
        a_ref[...] = jnp.zeros_like(a_ref)

    # Logits tile: anchor block is pre-scaled by 1/temperature, contrast block is
    # pre-transposed to (D, N) -> plain (tq,D)x(D,tk) MXU matmul, f32 accumulate.
    s = lax.dot_general(q_ref[...], kt_ref[...],
                        dimension_numbers=(((1,), (0,)), ((), ())),
                        preferred_element_type=jnp.float32)

    def update(lmask):
        """Online log-sum-exp + positive-numerator update for this tile."""
        s_eff = s if lmask is None else jnp.where(lmask, s, _NEG)
        pos = labq_ref[...] == labk_ref[...]           # (tq,1)==(1,tk) -> (tq,tk)
        if lmask is not None:
            pos = jnp.logical_and(pos, lmask)
        if normalized:
            # |logits| <= max_logit statically: skip the running max entirely.
            p = jnp.exp(s_eff - max_logit)             # masked entries underflow to 0
            l_ref[...] += jnp.sum(p, axis=1, keepdims=True)
        else:
            m_prev = m_ref[...]
            m_new = jnp.maximum(m_prev, jnp.max(s_eff, axis=1, keepdims=True))
            p = jnp.exp(s_eff - m_new)
            if lmask is not None:
                # robust even if a row of this tile is fully masked
                p = jnp.where(lmask, p, 0.0)
            l_ref[...] = (jnp.exp(m_prev - m_new) * l_ref[...]
                          + jnp.sum(p, axis=1, keepdims=True))
            m_ref[...] = m_new
        # numerator: pos is a subset of lmask, so s_eff == s on positive entries.
        a_ref[...] += jnp.sum(jnp.where(pos, s_eff, 0.0), axis=1, keepdims=True)

    # A tile needs the logits_mask only if it touches the self-contrast diagonal
    # or the zero-padded tail columns; all interior tiles take the fast path.
    q_lo = qi * tq
    k_lo = ki * tk
    has_diag = jnp.logical_and(q_lo < k_lo + tk, k_lo < q_lo + tq)
    if pad_exists:
        needs_mask = jnp.logical_or(has_diag, ki == last_k)
    else:
        needs_mask = has_diag

    @pl.when(needs_mask)
    def _masked():
        row_ids = q_lo + lax.broadcasted_iota(jnp.int32, (tq, 1), 0)
        col_ids = k_lo + lax.broadcasted_iota(jnp.int32, (1, tk), 1)
        lmask = jnp.logical_and(row_ids != col_ids, col_ids < n_valid)
        update(lmask)

    @pl.when(jnp.logical_not(needs_mask))
    def _fast():
        update(None)

    @pl.when(ki == last_k)
    def _finalize():
        if normalized:
            lse = max_logit + jnp.log(l_ref[...])
        else:
            lse = m_ref[...] + jnp.log(l_ref[...])
        cnt = cnt_ref[...]
        safe_cnt = jnp.where(cnt > 0.5, cnt, 1.0)
        # sum(mask * log_prob) = A - cnt * lse ; the row-max cancels exactly.
        mean_log_prob_pos = a_ref[...] / safe_cnt - lse
        rows = q_lo + lax.broadcasted_iota(jnp.int32, (tq, 1), 0)
        # Anchors with zero positives are NaN in the torch code; emit 0 instead
        # (padded / non-anchor rows likewise) so the mean stays finite.
        valid = jnp.logical_and(rows < m_valid, cnt > 0.5)
        out_ref[...] = jnp.where(valid, -loss_scale * mean_log_prob_pos, 0.0)


def supcon_loss(features, labels=None, mask=None, temperature=0.07,
                contrast_mode='all', base_temperature=0.07,
                tile=512, tile_q=None, tile_k=None,
                matmul_dtype=jnp.bfloat16, normalized_inputs=False):
    """Pallas TPU implementation of SupConLoss.forward (modes 'all' and 'one').

    normalized_inputs=True enables the static-max fast path and is only valid
    when features are L2-normalized along the last dim (the standard setup).
    """
    if features.ndim < 3:
        raise ValueError('`features` needs to be [bsz, n_views, ...], '
                         'at least 3 dimensions are required')
    if features.ndim > 3:
        features = features.reshape(features.shape[0], features.shape[1], -1)
    bsz, n_views, d = features.shape

    if labels is not None and mask is not None:
        raise ValueError('Cannot define both `labels` and `mask`')
    elif labels is None and mask is None:
        # SimCLR: eye(bsz) mask == equality of distinct per-sample labels.
        labels_vec = jnp.arange(bsz, dtype=jnp.int32)
    elif labels is not None:
        labels_vec = jnp.asarray(labels).reshape(-1).astype(jnp.int32)
        if labels_vec.shape[0] != bsz:
            raise ValueError('Num of labels does not match num of features')
    else:
        # TODO(synk): arbitrary (possibly asymmetric) [bsz,bsz] mask needs an
        # in-kernel gather of a non-equivalence mask; only labels/None supported.
        raise NotImplementedError(
            'Pallas SupConLoss supports `labels` or labels=mask=None (SimCLR).')

    contrast_count = n_views
    # torch.cat(torch.unbind(features, dim=1), dim=0) -> [n_views*bsz, D]
    contrast_feature = jnp.transpose(features, (1, 0, 2)).reshape(
        n_views * bsz, d).astype(jnp.float32)
    if contrast_mode == 'one':
        anchor_count = 1
    elif contrast_mode == 'all':
        anchor_count = contrast_count
    else:
        raise ValueError(f'Unknown mode: {contrast_mode}')

    n = bsz * contrast_count          # number of contrast columns
    m = bsz * anchor_count            # number of anchor rows (rows 0..m-1)

    inv_temp = 1.0 / float(temperature)
    loss_scale = float(temperature) / float(base_temperature)

    # ---- tiling (lane dims multiples of 128; sublane dims multiples of 8)
    d_pad = _round_up(max(d, 1), 128)

    tk = int(tile_k) if tile_k is not None else int(tile)
    tk = max(128, _round_up(tk, 128))
    tk = min(tk, _round_up(n, 128))
    n_pad = _round_up(n, tk)
    grid_k = n_pad // tk
    pad_exists = n_pad > n            # padding, if any, lives only in the last col tile

    tq = int(tile_q) if tile_q is not None else int(tile)
    tq = max(8, _round_up(tq, 8))
    tq = min(tq, _round_up(m, 8))
    grid_q = _round_up(m, tq) // tq
    if grid_q == 1 and m >= 16:
        # keep >=2 row tiles so the "parallel" axis can shard across both
        # TensorCores on v7x (1-TC chips just see slightly smaller row tiles).
        tq = _round_up((m + 1) // 2, 8)
        grid_q = _round_up(m, tq) // tq
    m_out = grid_q * tq

    # ---- label-only preprocessing hoisted out of the kernel
    same = (labels_vec[:, None] == labels_vec[None, :]).astype(jnp.int32)
    cnt_sample = n_views * jnp.sum(same, axis=1) - 1          # positives per sample
    cnt_anchor = jnp.tile(cnt_sample, anchor_count).astype(jnp.float32)
    cnt_anchor = jnp.pad(cnt_anchor, (0, m_out - m)).reshape(m_out, 1)

    lab_contrast_vec = jnp.tile(labels_vec, contrast_count)   # [n]
    lab_anchor = jnp.pad(lab_contrast_vec[:m], (0, m_out - m),
                         constant_values=-2).reshape(m_out, 1)
    lab_contrast = jnp.pad(lab_contrast_vec, (0, n_pad - n),
                           constant_values=-1).reshape(1, n_pad)

    # anchor rows pre-scaled by 1/T (folds the logits scale out of the hot loop)
    anchor = (contrast_feature[:m] * inv_temp).astype(matmul_dtype)
    anchor = jnp.pad(anchor, ((0, m_out - m), (0, d_pad - d)))
    # contrast pre-transposed to (D, N): no per-tile transpose on the MXU path
    contrast_t = jnp.pad(contrast_feature.astype(matmul_dtype),
                         ((0, n_pad - n), (0, d_pad - d))).T    # (d_pad, n_pad)

    kernel = functools.partial(
        _supcon_tile_kernel, tq=tq, tk=tk, n_valid=n, m_valid=m,
        pad_exists=bool(pad_exists), normalized=bool(normalized_inputs),
        max_logit=inv_temp, loss_scale=loss_scale)

    # explicit VMEM budget: covers the (tq,tk) f32 temps + double-buffered feature
    # blocks; raises v5e's 16 MiB scoped default, stays well below v7x's 64 MiB.
    vmem_limit = int(min(56 * 2**20, max(32 * 2**20, 10 * tq * tk * 4)))

    per_anchor = pl.pallas_call(
        kernel,
        out_shape=jax.ShapeDtypeStruct((m_out, 1), jnp.float32),
        grid_spec=pltpu.PrefetchScalarGridSpec(
            num_scalar_prefetch=0,
            grid=(grid_q, grid_k),
            in_specs=[
                pl.BlockSpec((tq, 1), lambda qi, ki: (qi, 0)),       # positives count
                pl.BlockSpec((tq, 1), lambda qi, ki: (qi, 0)),       # anchor labels
                pl.BlockSpec((1, tk), lambda qi, ki: (0, ki)),       # contrast labels
                pl.BlockSpec((tq, d_pad), lambda qi, ki: (qi, 0)),   # anchor feats (pre-scaled)
                pl.BlockSpec((d_pad, tk), lambda qi, ki: (0, ki)),   # contrast feats^T
            ],
            out_specs=pl.BlockSpec((tq, 1), lambda qi, ki: (qi, 0)),
            scratch_shapes=[
                pltpu.VMEM((tq, 1), jnp.float32),   # running max m (unused if normalized)
                pltpu.VMEM((tq, 1), jnp.float32),   # running sum-exp l
                pltpu.VMEM((tq, 1), jnp.float32),   # A = sum(mask * raw logits)
            ],
        ),
        compiler_params=pltpu.CompilerParams(
            dimension_semantics=("parallel", "arbitrary"),
            vmem_limit_bytes=vmem_limit),
    )(cnt_anchor, lab_anchor, lab_contrast, anchor, contrast_t)

    # loss.view(anchor_count, batch_size).mean() == mean over all m anchors.
    return jnp.sum(per_anchor) / float(m)


def _supcon_loss_ref(features, labels=None, temperature=0.07, contrast_mode='all',
                     base_temperature=0.07, matmul_dtype=jnp.float32):
    """Pure-JAX reference mirroring the PyTorch code (anchor pre-scaled by 1/T,
    matching the kernel's rounding order)."""
    bsz, n_views, d = features.shape
    if labels is None:
        mask = jnp.eye(bsz, dtype=jnp.float32)
    else:
        labels = labels.reshape(-1, 1)
        mask = (labels == labels.T).astype(jnp.float32)
    feat = jnp.transpose(features, (1, 0, 2)).reshape(n_views * bsz, d)
    if contrast_mode == 'one':
        anchor = feat[:bsz]
        anchor_count = 1
    else:
        anchor = feat
        anchor_count = n_views
    anchor_s = (anchor * (1.0 / temperature)).astype(matmul_dtype)
    logits = jnp.dot(anchor_s, feat.astype(matmul_dtype).T,
                     preferred_element_type=jnp.float32)
    logits = logits - jnp.max(logits, axis=1, keepdims=True)
    m = anchor_count * bsz
    n = n_views * bsz
    mask = jnp.tile(mask, (anchor_count, n_views))
    logits_mask = 1.0 - (jnp.arange(m)[:, None] == jnp.arange(n)[None, :]).astype(jnp.float32)
    mask = mask * logits_mask
    exp_logits = jnp.exp(logits) * logits_mask
    log_prob = logits - jnp.log(exp_logits.sum(1, keepdims=True))
    mean_log_prob_pos = (mask * log_prob).sum(1) / mask.sum(1)
    loss = -(temperature / base_temperature) * mean_log_prob_pos
    return loss.mean()


if __name__ == "__main__":
    key = jax.random.PRNGKey(0)
    k1, k2, k3, k4 = jax.random.split(key, 4)

    # --- small case (single column tile, 2 row tiles): bsz=8, n_views=2, D=32 ---
    bsz, n_views, feat_dim = 8, 2, 32
    features = jax.random.normal(k1, (bsz, n_views, feat_dim), dtype=jnp.float32)
    features = features / jnp.linalg.norm(features, axis=-1, keepdims=True)
    labels = jax.random.randint(k2, (bsz,), 0, 4)

    # exact-math validation: f32 MXU path vs f32 reference
    loss_f32 = jax.block_until_ready(
        supcon_loss(features, labels=labels, matmul_dtype=jnp.float32))
    ref_f32 = _supcon_loss_ref(features, labels, matmul_dtype=jnp.float32)
    assert jnp.isfinite(loss_f32), loss_f32
    assert jnp.allclose(loss_f32, ref_f32, rtol=1e-4, atol=1e-4), (loss_f32, ref_f32)

    # default bf16 MXU path vs bf16-matched reference
    loss = jax.block_until_ready(supcon_loss(features, labels=labels))
    ref = _supcon_loss_ref(features, labels, matmul_dtype=jnp.bfloat16)
    assert jnp.allclose(loss, ref, rtol=1e-3, atol=1e-3), (loss, ref)

    # normalized-features fast path (static row max)
    loss_nrm = jax.block_until_ready(
        supcon_loss(features, labels=labels, normalized_inputs=True))
    assert jnp.allclose(loss_nrm, ref, rtol=1e-3, atol=1e-3), (loss_nrm, ref)

    # SimCLR path (labels=None) and contrast_mode='one'
    loss_u = jax.block_until_ready(supcon_loss(features))
    ref_u = _supcon_loss_ref(features, None, matmul_dtype=jnp.bfloat16)
    assert jnp.allclose(loss_u, ref_u, rtol=1e-3, atol=1e-3), (loss_u, ref_u)

    loss_one = jax.block_until_ready(
        supcon_loss(features, labels=labels, contrast_mode='one'))
    ref_one = _supcon_loss_ref(features, labels, contrast_mode='one',
                               matmul_dtype=jnp.bfloat16)
    assert jnp.allclose(loss_one, ref_one, rtol=1e-3, atol=1e-3), (loss_one, ref_one)

    # --- tiled case: N=288; default tile, then tile=128 to exercise the interior
    #     fast-path tiles + the padded last column tile, then the fast LSE path.
    bsz2, views2, dim2 = 72, 4, 64
    feats2 = jax.random.normal(k3, (bsz2, views2, dim2), dtype=jnp.float32)
    feats2 = feats2 / jnp.linalg.norm(feats2, axis=-1, keepdims=True)
    labels2 = jax.random.randint(k4, (bsz2,), 0, 10)
    ref2 = _supcon_loss_ref(feats2, labels2, matmul_dtype=jnp.bfloat16)

    loss2 = jax.block_until_ready(supcon_loss(feats2, labels=labels2))
    assert jnp.allclose(loss2, ref2, rtol=1e-3, atol=1e-3), (loss2, ref2)

    loss2_small = jax.block_until_ready(
        supcon_loss(feats2, labels=labels2, tile=128))
    assert jnp.allclose(loss2_small, ref2, rtol=1e-3, atol=1e-3), (loss2_small, ref2)

    loss2_nrm = jax.block_until_ready(
        supcon_loss(feats2, labels=labels2, tile=128, normalized_inputs=True))
    assert jnp.allclose(loss2_nrm, ref2, rtol=1e-3, atol=1e-3), (loss2_nrm, ref2)

    print("KERNEL_OK")
</pallas_src>

<mosaic_0001>
module attributes {stable_mosaic.version = 11 : i64} {
  func.func @_supcon_tile_kernel(%arg0: i32, %arg1: i32, %arg2: memref<8x1xf32, #tpu.memory_space<vmem>>, %arg3: memref<8x1xi32, #tpu.memory_space<vmem>>, %arg4: memref<1x128xi32, #tpu.memory_space<vmem>>, %arg5: memref<8x128xf32, #tpu.memory_space<vmem>>, %arg6: memref<128x128xf32, #tpu.memory_space<vmem>>, %arg7: memref<8x1xf32, #tpu.memory_space<vmem>>, %arg8: memref<8x1xf32, #tpu.memory_space<vmem>>, %arg9: memref<8x1xf32, #tpu.memory_space<vmem>>, %arg10: memref<8x1xf32, #tpu.memory_space<vmem>>) attributes {dimension_semantics = [#tpu.dimension_semantics<parallel>, #tpu.dimension_semantics<arbitrary>], iteration_bounds = array<i64: 2, 1>, scalar_prefetch = 0 : i64, scratch_operands = 3 : i64, tpu.core_type = #tpu.core_type<tc>, window_params = [{transform_indices = @transform_0, window_bounds = array<i64: 8, 1>}, {transform_indices = @transform_1, window_bounds = array<i64: 8, 1>}, {transform_indices = @transform_2, window_bounds = array<i64: 1, 128>}, {transform_indices = @transform_3, window_bounds = array<i64: 8, 128>}, {transform_indices = @transform_4, window_bounds = array<i64: 128, 128>}, {transform_indices = @transform_5, window_bounds = array<i64: 8, 1>}]} {
    %c0_i32 = arith.constant 0 : i32
    %0 = arith.cmpi eq, %arg1, %c0_i32 : i32
    %1 = arith.extui %0 : i1 to i32
    %c0_i32_0 = arith.constant 0 : i32
    %2 = arith.cmpi ne, %1, %c0_i32_0 : i32
    scf.if %2 {
      %cst_11 = arith.constant -1.000000e+30 : f32
      %23 = vector.broadcast %cst_11 : f32 to vector<8x1xf32>
      %c0_12 = arith.constant 0 : index
      %c0_13 = arith.constant 0 : index
      %24 = vector.load %arg8[%c0_12, %c0_13] : memref<8x1xf32, #tpu.memory_space<vmem>>, vector<8x1xf32>
      tpu.vector_store %arg8[%c0_12, %c0_13], %23 {strides = array<i32>} : memref<8x1xf32, #tpu.memory_space<vmem>>, vector<8x1xf32>,
      %cst_14 = arith.constant 0.000000e+00 : f32
      %25 = vector.broadcast %cst_14 : f32 to vector<8x1xf32>
      %c0_15 = arith.constant 0 : index
      %c0_16 = arith.constant 0 : index
      %26 = vector.load %arg9[%c0_15, %c0_16] : memref<8x1xf32, #tpu.memory_space<vmem>>, vector<8x1xf32>
      tpu.vector_store %arg9[%c0_15, %c0_16], %25 {strides = array<i32>} : memref<8x1xf32, #tpu.memory_space<vmem>>, vector<8x1xf32>,
      %cst_17 = arith.constant 0.000000e+00 : f32
      %27 = vector.broadcast %cst_17 : f32 to vector<8x1xf32>
      %c0_18 = arith.constant 0 : index
      %c0_19 = arith.constant 0 : index
      %28 = vector.load %arg10[%c0_18, %c0_19] : memref<8x1xf32, #tpu.memory_space<vmem>>, vector<8x1xf32>
      tpu.vector_store %arg10[%c0_18, %c0_19], %27 {strides = array<i32>} : memref<8x1xf32, #tpu.memory_space<vmem>>, vector<8x1xf32>,
    } else {
    }
    %c0 = arith.constant 0 : index
    %c0_1 = arith.constant 0 : index
    %3 = vector.load %arg5[%c0, %c0_1] : memref<8x128xf32, #tpu.memory_space<vmem>>, vector<8x128xf32>
    %c0_2 = arith.constant 0 : index
    %c0_3 = arith.constant 0 : index
    %4 = vector.load %arg6[%c0_2, %c0_3] : memref<128x128xf32, #tpu.memory_space<vmem>>, vector<128x128xf32>
    %cst = arith.constant dense<0.000000e+00> : vector<8x128xf32>
    %5 = tpu.matmul %3, %4, %cst {dimension_numbers = #tpu.dot_dimension_numbers<[1], [0], [0], [1], [0, 0, 1, 1], [], []>} : vector<8x128xf32>, vector<128x128xf32>, vector<8x128xf32> -> vector<8x128xf32>
    %c8_i32 = arith.constant 8 : i32
    %6 = arith.muli %arg0, %c8_i32 : i32
    %c128_i32 = arith.constant 128 : i32
    %7 = arith.muli %arg1, %c128_i32 : i32
    %c128_i32_4 = arith.constant 128 : i32
    %8 = arith.addi %7, %c128_i32_4 : i32
    %9 = arith.cmpi slt, %6, %8 : i32
    %c8_i32_5 = arith.constant 8 : i32
    %10 = arith.addi %6, %c8_i32_5 : i32
    %11 = arith.cmpi slt, %7, %10 : i32
    %12 = arith.andi %9, %11 : i1
    %c0_i32_6 = arith.constant 0 : i32
    %13 = arith.cmpi eq, %arg1, %c0_i32_6 : i32
    %14 = arith.ori %12, %13 : i1
    %15 = arith.extui %14 : i1 to i32
    %c0_i32_7 = arith.constant 0 : i32
    %16 = arith.cmpi ne, %15, %c0_i32_7 : i32
    scf.if %16 {
      %23 = tpu.iota {dimensions = array<i32: 0>} : vector<8x1xi32>
      %24 = vector.broadcast %6 : i32 to vector<8x1xi32>
      %25 = arith.addi %24, %23 : vector<8x1xi32>
      %26 = tpu.iota {dimensions = array<i32: 1>} : vector<1x128xi32>
      %27 = vector.broadcast %7 : i32 to vector<1x128xi32>
      %28 = arith.addi %27, %26 : vector<1x128xi32>
      %29 = vector.broadcast %25 : vector<8x1xi32> to vector<8x128xi32>
      %30 = vector.broadcast %28 : vector<1x128xi32> to vector<8x128xi32>
      %31 = arith.cmpi ne, %29, %30 : vector<8x128xi32>
      %c16_i32 = arith.constant 16 : i32
      %32 = vector.broadcast %c16_i32 : i32 to vector<1x128xi32>
      %33 = arith.cmpi slt, %28, %32 : vector<1x128xi32>
      %34 = vector.broadcast %33 : vector<1x128xi1> to vector<8x128xi1>
      %35 = arith.andi %31, %34 : vector<8x128xi1>
      %cst_11 = arith.constant -1.000000e+30 : f32
      %36 = vector.broadcast %cst_11 : f32 to vector<8x128xf32>
      %37 = arith.select %35, %5, %36 : vector<8x128xi1>, vector<8x128xf32>
      %c0_12 = arith.constant 0 : index
      %c0_13 = arith.constant 0 : index
      %38 = vector.load %arg3[%c0_12, %c0_13] : memref<8x1xi32, #tpu.memory_space<vmem>>, vector<8x1xi32>
      %c0_14 = arith.constant 0 : index
      %c0_15 = arith.constant 0 : index
      %39 = vector.load %arg4[%c0_14, %c0_15] : memref<1x128xi32, #tpu.memory_space<vmem>>, vector<1x128xi32>
      %40 = vector.broadcast %38 : vector<8x1xi32> to vector<8x128xi32>
      %41 = vector.broadcast %39 : vector<1x128xi32> to vector<8x128xi32>
      %42 = arith.cmpi eq, %40, %41 : vector<8x128xi32>
      %43 = arith.andi %42, %35 : vector<8x128xi1>
      %c0_16 = arith.constant 0 : index
      %c0_17 = arith.constant 0 : index
      %44 = vector.load %arg8[%c0_16, %c0_17] : memref<8x1xf32, #tpu.memory_space<vmem>>, vector<8x1xf32>
      %cst_18 = arith.constant dense<0xFF800000> : vector<8xf32>
      %45 = vector.multi_reduction <maximumf>, %37, %cst_18 [1] : vector<8x128xf32> to vector<8xf32>
      %46 = vector.shape_cast %45 : vector<8xf32> to vector<8x1xf32>
      %47 = arith.maximumf %44, %46 : vector<8x1xf32>
      %48 = vector.broadcast %47 : vector<8x1xf32> to vector<8x128xf32>
      %49 = arith.subf %37, %48 : vector<8x128xf32>
      %50 = math.exp %49 : vector<8x128xf32>
      %cst_19 = arith.constant 0.000000e+00 : f32
      %51 = vector.broadcast %cst_19 : f32 to vector<8x128xf32>
      %52 = arith.select %35, %50, %51 : vector<8x128xi1>, vector<8x128xf32>
      %53 = arith.subf %44, %47 : vector<8x1xf32>
      %54 = math.exp %53 : vector<8x1xf32>
      %c0_20 = arith.constant 0 : index
      %c0_21 = arith.constant 0 : index
      %55 = vector.load %arg9[%c0_20, %c0_21] : memref<8x1xf32, #tpu.memory_space<vmem>>, vector<8x1xf32>
      %56 = arith.mulf %54, %55 : vector<8x1xf32>
      %cst_22 = arith.constant dense<0.000000e+00> : vector<8xf32>
      %57 = vector.multi_reduction <add>, %52, %cst_22 [1] : vector<8x128xf32> to vector<8xf32>
      %58 = vector.shape_cast %57 : vector<8xf32> to vector<8x1xf32>
      %59 = arith.addf %56, %58 : vector<8x1xf32>
      %c0_23 = arith.constant 0 : index
      %c0_24 = arith.constant 0 : index
      %60 = vector.load %arg9[%c0_23, %c0_24] : memref<8x1xf32, #tpu.memory_space<vmem>>, vector<8x1xf32>
      tpu.vector_store %arg9[%c0_23, %c0_24], %59 {strides = array<i32>} : memref<8x1xf32, #tpu.memory_space<vmem>>, vector<8x1xf32>,
      %c0_25 = arith.constant 0 : index
      %c0_26 = arith.constant 0 : index
      %61 = vector.load %arg8[%c0_25, %c0_26] : memref<8x1xf32, #tpu.memory_space<vmem>>, vector<8x1xf32>
      tpu.vector_store %arg8[%c0_25, %c0_26], %47 {strides = array<i32>} : memref<8x1xf32, #tpu.memory_space<vmem>>, vector<8x1xf32>,
      %c0_27 = arith.constant 0 : index
      %c0_28 = arith.constant 0 : index
      %62 = vector.load %arg10[%c0_27, %c0_28] : memref<8x1xf32, #tpu.memory_space<vmem>>, vector<8x1xf32>
      %cst_29 = arith.constant 0.000000e+00 : f32
      %63 = vector.broadcast %cst_29 : f32 to vector<8x128xf32>
      %64 = arith.select %43, %37, %63 : vector<8x128xi1>, vector<8x128xf32>
      %cst_30 = arith.constant dense<0.000000e+00> : vector<8xf32>
      %65 = vector.multi_reduction <add>, %64, %cst_30 [1] : vector<8x128xf32> to vector<8xf32>
      %66 = vector.shape_cast %65 : vector<8xf32> to vector<8x1xf32>
      %67 = arith.addf %62, %66 : vector<8x1xf32>
      %c0_31 = arith.constant 0 : index
      %c0_32 = arith.constant 0 : index
      %68 = vector.load %arg10[%c0_31, %c0_32] : memref<8x1xf32, #tpu.memory_space<vmem>>, vector<8x1xf32>
      tpu.vector_store %arg10[%c0_31, %c0_32], %67 {strides = array<i32>} : memref<8x1xf32, #tpu.memory_space<vmem>>, vector<8x1xf32>,
    } else {
    }
    %true = arith.constant true
    %17 = arith.xori %14, %true : i1
    %18 = arith.extui %17 : i1 to i32
    %c0_i32_8 = arith.constant 0 : i32
    %19 = arith.cmpi ne, %18, %c0_i32_8 : i32
    scf.if %19 {
      %c0_11 = arith.constant 0 : index
      %c0_12 = arith.constant 0 : index
      %23 = vector.load %arg3[%c0_11, %c0_12] : memref<8x1xi32, #tpu.memory_space<vmem>>, vector<8x1xi32>
      %c0_13 = arith.constant 0 : index
      %c0_14 = arith.constant 0 : index
      %24 = vector.load %arg4[%c0_13, %c0_14] : memref<1x128xi32, #tpu.memory_space<vmem>>, vector<1x128xi32>
      %25 = vector.broadcast %23 : vector<8x1xi32> to vector<8x128xi32>
      %26 = vector.broadcast %24 : vector<1x128xi32> to vector<8x128xi32>
      %27 = arith.cmpi eq, %25, %26 : vector<8x128xi32>
      %c0_15 = arith.constant 0 : index
      %c0_16 = arith.constant 0 : index
      %28 = vector.load %arg8[%c0_15, %c0_16] : memref<8x1xf32, #tpu.memory_space<vmem>>, vector<8x1xf32>
      %cst_17 = arith.constant dense<0xFF800000> : vector<8xf32>
      %29 = vector.multi_reduction <maximumf>, %5, %cst_17 [1] : vector<8x128xf32> to vector<8xf32>
      %30 = vector.shape_cast %29 : vector<8xf32> to vector<8x1xf32>
      %31 = arith.maximumf %28, %30 : vector<8x1xf32>
      %32 = vector.broadcast %31 : vector<8x1xf32> to vector<8x128xf32>
      %33 = arith.subf %5, %32 : vector<8x128xf32>
      %34 = math.exp %33 : vector<8x128xf32>
      %35 = arith.subf %28, %31 : vector<8x1xf32>
      %36 = math.exp %35 : vector<8x1xf32>
      %c0_18 = arith.constant 0 : index
      %c0_19 = arith.constant 0 : index
      %37 = vector.load %arg9[%c0_18, %c0_19] : memref<8x1xf32, #tpu.memory_space<vmem>>, vector<8x1xf32>
      %38 = arith.mulf %36, %37 : vector<8x1xf32>
      %cst_20 = arith.constant dense<0.000000e+00> : vector<8xf32>
      %39 = vector.multi_reduction <add>, %34, %cst_20 [1] : vector<8x128xf32> to vector<8xf32>
      %40 = vector.shape_cast %39 : vector<8xf32> to vector<8x1xf32>
      %41 = arith.addf %38, %40 : vector<8x1xf32>
      %c0_21 = arith.constant 0 : index
      %c0_22 = arith.constant 0 : index
      %42 = vector.load %arg9[%c0_21, %c0_22] : memref<8x1xf32, #tpu.memory_space<vmem>>, vector<8x1xf32>
      tpu.vector_store %arg9[%c0_21, %c0_22], %41 {strides = array<i32>} : memref<8x1xf32, #tpu.memory_space<vmem>>, vector<8x1xf32>,
      %c0_23 = arith.constant 0 : index
      %c0_24 = arith.constant 0 : index
      %43 = vector.load %arg8[%c0_23, %c0_24] : memref<8x1xf32, #tpu.memory_space<vmem>>, vector<8x1xf32>
      tpu.vector_store %arg8[%c0_23, %c0_24], %31 {strides = array<i32>} : memref<8x1xf32, #tpu.memory_space<vmem>>, vector<8x1xf32>,
      %c0_25 = arith.constant 0 : index
      %c0_26 = arith.constant 0 : index
      %44 = vector.load %arg10[%c0_25, %c0_26] : memref<8x1xf32, #tpu.memory_space<vmem>>, vector<8x1xf32>
      %cst_27 = arith.constant 0.000000e+00 : f32
      %45 = vector.broadcast %cst_27 : f32 to vector<8x128xf32>
      %46 = arith.select %27, %5, %45 : vector<8x128xi1>, vector<8x128xf32>
      %cst_28 = arith.constant dense<0.000000e+00> : vector<8xf32>
      %47 = vector.multi_reduction <add>, %46, %cst_28 [1] : vector<8x128xf32> to vector<8xf32>
      %48 = vector.shape_cast %47 : vector<8xf32> to vector<8x1xf32>
      %49 = arith.addf %44, %48 : vector<8x1xf32>
      %c0_29 = arith.constant 0 : index
      %c0_30 = arith.constant 0 : index
      %50 = vector.load %arg10[%c0_29, %c0_30] : memref<8x1xf32, #tpu.memory_space<vmem>>, vector<8x1xf32>
      tpu.vector_store %arg10[%c0_29, %c0_30], %49 {strides = array<i32>} : memref<8x1xf32, #tpu.memory_space<vmem>>, vector<8x1xf32>,
    } else {
    }
    %c0_i32_9 = arith.constant 0 : i32
    %20 = arith.cmpi eq, %arg1, %c0_i32_9 : i32
    %21 = arith.extui %20 : i1 to i32
    %c0_i32_10 = arith.constant 0 : i32
    %22 = arith.cmpi ne, %21, %c0_i32_10 : i32
    scf.if %22 {
      %c0_11 = arith.constant 0 : index
      %c0_12 = arith.constant 0 : index
      %23 = vector.load %arg8[%c0_11, %c0_12] : memref<8x1xf32, #tpu.memory_space<vmem>>, vector<8x1xf32>
      %c0_13 = arith.constant 0 : index
      %c0_14 = arith.constant 0 : index
      %24 = vector.load %arg9[%c0_13, %c0_14] : memref<8x1xf32, #tpu.memory_space<vmem>>, vector<8x1xf32>
      %25 = math.log %24 : vector<8x1xf32>
      %26 = arith.addf %23, %25 : vector<8x1xf32>
      %c0_15 = arith.constant 0 : index
      %c0_16 = arith.constant 0 : index
      %27 = vector.load %arg2[%c0_15, %c0_16] : memref<8x1xf32, #tpu.memory_space<vmem>>, vector<8x1xf32>
      %cst_17 = arith.constant 5.000000e-01 : f32
      %28 = vector.broadcast %cst_17 : f32 to vector<8x1xf32>
      %29 = arith.cmpf ogt, %27, %28 : vector<8x1xf32>
      %cst_18 = arith.constant 1.000000e+00 : f32
      %30 = vector.broadcast %cst_18 : f32 to vector<8x1xf32>
      %31 = arith.select %29, %27, %30 : vector<8x1xi1>, vector<8x1xf32>
      %c0_19 = arith.constant 0 : index
      %c0_20 = arith.constant 0 : index
      %32 = vector.load %arg10[%c0_19, %c0_20] : memref<8x1xf32, #tpu.memory_space<vmem>>, vector<8x1xf32>
      %33 = arith.divf %32, %31 : vector<8x1xf32>
      %34 = arith.subf %33, %26 : vector<8x1xf32>
      %35 = tpu.iota {dimensions = array<i32: 0>} : vector<8x1xi32>
      %36 = vector.broadcast %6 : i32 to vector<8x1xi32>
      %37 = arith.addi %36, %35 : vector<8x1xi32>
      %c16_i32 = arith.constant 16 : i32
      %38 = vector.broadcast %c16_i32 : i32 to vector<8x1xi32>
      %39 = arith.cmpi slt, %37, %38 : vector<8x1xi32>
      %cst_21 = arith.constant 5.000000e-01 : f32
      %40 = vector.broadcast %cst_21 : f32 to vector<8x1xf32>
      %41 = arith.cmpf ogt, %27, %40 : vector<8x1xf32>
      %42 = arith.andi %39, %41 : vector<8x1xi1>
      %cst_22 = arith.constant -1.000000e+00 : f32
      %43 = vector.broadcast %cst_22 : f32 to vector<8x1xf32>
      %44 = arith.mulf %43, %34 : vector<8x1xf32>
      %cst_23 = arith.constant 0.000000e+00 : f32
      %45 = vector.broadcast %cst_23 : f32 to vector<8x1xf32>
      %46 = arith.select %42, %44, %45 : vector<8x1xi1>, vector<8x1xf32>
      %c0_24 = arith.constant 0 : index
      %c0_25 = arith.constant 0 : index
      %47 = vector.load %arg7[%c0_24, %c0_25] : memref<8x1xf32, #tpu.memory_space<vmem>>, vector<8x1xf32>
      tpu.vector_store %arg7[%c0_24, %c0_25], %46 {strides = array<i32>} : memref<8x1xf32, #tpu.memory_space<vmem>>, vector<8x1xf32>,
    } else {
    }
    return
  }
  func.func @transform_0(%arg0: i32, %arg1: i32) -> (i32, i32) {
    %c0_i32 = arith.constant 0 : i32
    %c0_i32_0 = arith.constant 0 : i32
    return %arg0, %c0_i32 : i32, i32
  }
  func.func @transform_1(%arg0: i32, %arg1: i32) -> (i32, i32) {
    %c0_i32 = arith.constant 0 : i32
    %c0_i32_0 = arith.constant 0 : i32
    return %arg0, %c0_i32 : i32, i32
  }
  func.func @transform_2(%arg0: i32, %arg1: i32) -> (i32, i32) {
    %c0_i32 = arith.constant 0 : i32
    %c0_i32_0 = arith.constant 0 : i32
    return %c0_i32, %arg1 : i32, i32
  }
  func.func @transform_3(%arg0: i32, %arg1: i32) -> (i32, i32) {
    %c0_i32 = arith.constant 0 : i32
    %c0_i32_0 = arith.constant 0 : i32
    return %arg0, %c0_i32 : i32, i32
  }
  func.func @transform_4(%arg0: i32, %arg1: i32) -> (i32, i32) {
    %c0_i32 = arith.constant 0 : i32
    %c0_i32_0 = arith.constant 0 : i32
    return %c0_i32, %arg1 : i32, i32
  }
  func.func @transform_5(%arg0: i32, %arg1: i32) -> (i32, i32) {
    %c0_i32 = arith.constant 0 : i32
    %c0_i32_0 = arith.constant 0 : i32
    return %arg0, %c0_i32 : i32, i32
  }
}

</mosaic_0001>

<bundles_post_ra>
// kernel: tpu_custom_call.1
= control target key start
LH: loop header
LB: loop body
LE: loop exit
PB: predicated region body
PF: predicated region fallthrough
CT: control target
= control target key end

     0   :  { %10 = vsyncpa [#allocation6], 0  ;;  %s763_s18 = smov 0   ;;  %s765_s19 = smov 0   ;;  %s845_s0 = inlined_call_operand.vmem [shape: f32[16,1], index: 0, kind: input, shape index: {}]   ;;  %s846_s1 = inlined_call_operand.vmem [shape: s32[16,1], index: 1, kind: input, shape index: {}]   ;;  %s847_s2 = inlined_call_operand.vmem [shape: s32[1,128], index: 2, kind: input, shape index: {}]   ;;  %s848_s3 = inlined_call_operand.vmem [shape: f32[16,128], index: 3, kind: input, shape index: {}]   ;;  %s849_s4 = inlined_call_operand.hbm [shape: f32[128,128], index: 4, kind: input, shape index: {}]   ;;  %s850_s5 = inlined_call_operand.vmem [shape: f32[16,1], index: 5, kind: output, shape index: {}]  }
   0x1   :  { %s767_s20 = smov 0  }
   0x2 LB: > { %s602_s21 = sadd.s32 4294967295, %s725_s20   ;;  %s28_s22 = sadd.s32 1, %s721_s19  ;;  %s725_s20 = sphi %s767_s20, %s16_s20   ;;  %s721_s19 = sphi %s765_s19, %s856_s19   ;;  %s717_s18 = sphi %s763_s18, %s855_s18  }
   0x3   : > { %p30_p0 = scmp.ge.s32.totalorder %s28_s22, 2  ;;  %p604_p1 = scmp.ge.s32.totalorder %s725_s20, 1 }
   0x4   : > { %p189_p2 = scmp.lt.s32.totalorder %s725_s20, 3  ;;  %p626_p4 = scmp.eq.s32.totalorder %s602_s21, 0 }
   0x5   : > { %s858_s22 = smov (%p30_p0, %s28_s22), 0  ;;  %s208_s25 = sshll.u32 %s849_s4, 4  ;;  %s209_s25 = int_to_ptr.hbm [resolvable:$true] %s208_s25 }
   0x6   : > { %p190_p3 = pnand %p604_p1, %p189_p2  ;;  %s727_s26 = smov [#allocation5]  }
   0x7   : > { %s210_s27 = sshll.u32 %s727_s26, 4  ;;  %s728_s28 = smov 128   ;;  %s211_s27 = int_to_ptr.vmem [resolvable:$true] %s210_s27 }
   0x8   : > { %p622_p5 = pneg %p190_p3  ;;  %s729_s29 = smov 8  }
   0x9   : > { %247 = sbr.rel (%p190_p3) target bundleno = 562 (0x232), region = 40 }
   0xa   : > { %p623_p6 = pnand %p626_p4, %p622_p5 }
   0xc   : > { %625 = dma.hbm_to_vmem [thread:$0]  (!%p623_p6), %s209_s25, 2048, %s211_s27, [#allocation6], %s728_s28, %s728_s28, %s729_s29  }
   0xe   : > { %712 = dma.done.wait (%p626_p4), [#allocation6], 2048  }
   0xf   : > { %714 = vsyncadd (%p626_p4), [#allocation6], 4294965248  ;;  %p285_p7 = scmp.lt.s32.totalorder %s717_s18, 1  ;;  %v328_v0 = vld [vmem:[#allocation5 + $0x78] sm:$0xff]  ;;  %v327_v1 = vld [vmem:[#allocation5 + $0x70] sm:$0xff]  ;;  %v730_v2 = vmov 0   ;;  %v361_v19 = vlaneseq }
  0x10   : > { %329 = vmatpush.msra.mxu0 %v328_v0  ;;  %659 = vset.pattern.permute.xlu1 %v730_v2  ;;  %v326_v3 = vld [vmem:[#allocation5 + $0x68] sm:$0xff]  ;;  %v325_v4 = vld [vmem:[#allocation5 + $0x60] sm:$0xff]  ;;  %v324_v5 = vld [vmem:[#allocation5 + $0x58] sm:$0xff]  ;;  %s614_s13 = sshll.u32 %s717_s18, 3  ;;  %vm308_vm3 = vcmask 7168   ;;  %v732_v33 = vmov 0.0  }
  0x11   : > { %s286_s30 = scalar_select %p285_p7, %s717_s18, 1  ;;  %658 = vset.pattern.permute.xlu0 %v730_v2  ;;  %v323_v7 = vld [vmem:[#allocation5 + $0x50] sm:$0xff]  ;;  %v322_v8 = vld [vmem:[#allocation5 + $0x48] sm:$0xff]  ;;  %v321_v9 = vld [vmem:[#allocation5 + $0x40] sm:$0xff]  ;;  %v362_v20 = vshrl.u32 %v361_v19, 7  ;;  %v363_v21 = vstv %s614_s13  ;;  %v366_v26 = vand.u32 127, %v361_v19 }
  0x12   : > { %330 = vmatpush.msra.mxu0 %v327_v1  ;;  %v320_v10 = vld [vmem:[#allocation5 + $0x38] sm:$0xff]  ;;  %v319_v11 = vld [vmem:[#allocation5 + $0x30] sm:$0xff]  ;;  %v318_v12 = vld [vmem:[#allocation5 + $0x28] sm:$0xff]  ;;  %v731_v25 = vmov -1e+30   ;;  %311 = vst.msk [vmem:[#allocation4] sm:$0xff] %vm308_vm3, %v732_v33 }
  0x13   : > { %s789_s6 = sshll.u32 %s286_s30, 3  ;;  %v317_v13 = vld [vmem:[#allocation5 + $0x20] sm:$0xff]  ;;  %v316_v14 = vld [vmem:[#allocation5 + $0x18] sm:$0xff]  ;;  %v315_v15 = vld [vmem:[#allocation5 + $0x10] sm:$0xff]  ;;  %v364_v23 = vadd.s32 %v363_v21, %v362_v20  ;;  %309 = vst.msk [vmem:[#allocation2] sm:$0xff] %vm308_vm3, %v731_v25  ;;  %vm370_vm5 = vcmp.lt.s32.totalorder %v366_v26, 16 }
  0x14   : > { %s292_s9 = scalar_lea.vmem %s846_s1, %s789_s6  ;;  %331 = vmatpush.msra.mxu0 %v326_v3  ;;  %v314_v16 = vld [vmem:[#allocation5 + $0x8] sm:$0xff]  ;;  %s299_s12 = scalar_lea.vmem %s848_s3, %s789_s6  ;;  %v313_v17 = vld [vmem:[#allocation5] sm:$0xff]  ;;  %310 = vst.msk [vmem:[#allocation3] sm:$0xff] %vm308_vm3, %v732_v33 }
  0x15   : > { %v375_v6 = vld [vmem:[%s292_s9] sm:$0xff]  ;;  %s288_s16 = scalar_lea.vmem %s845_s0, %s789_s6  ;;  %vm484_vm1 = vcmp.lt.s32.totalorder %v364_v23, 16  ;;  %vm369_vm4 = vcmp.ne.s32.totalorder %v364_v23, %v366_v26  ;;  %s303_s24 = scalar_lea.vmem %s850_s5, %s789_s6 }
  0x16   : > { %332 = vmatpush.msra.mxu0 %v325_v4  ;;  %378 = vperm.xlu1 %659, %v375_v6   ;;  %v312_v18 = vld [vmem:[%s299_s12] sm:$0xff]  ;;  %vm813_vm7 = vmand %vm369_vm4, %vm370_vm5 }
  0x17   : > { %v460_v22 = vld [vmem:[%s288_s16] sm:$0xff] }
  0x18   : > { %333 = vmatpush.msra.mxu0 %v324_v5  ;;  %vm461_vm0 = vcmp.gt.f32.partialorder %v460_v22, 0.5  ;;  %v660_v27 = vld [vmem:[%s847_s2] ss:$0 sm:$0xff] }
  0x19   : > { %vm805_vm2 = vmand %vm484_vm1, %vm461_vm0  ;;  %v407_v35 = vld [vmem:[#allocation4] sm:$0xff]  ;;  %v462_v46 = vsel %vm461_vm0, %v460_v22, 1.0 }
  0x1a   : > { %334 = vmatpush.msra.mxu0 %v323_v7  ;;  %v383_v34 = vld [vmem:[#allocation2] sm:$0xff]  ;;  %vm469_vm9 = vweird.f32 %v462_v46  ;;  %v475_v57 = vand.u32 2147483648, %v462_v46  ;;  %v473_v59 = vand.u32 2147483647, %v462_v46 }
  0x1b   : > { %v399_v50 = vld [vmem:[#allocation3] sm:$0xff] }
  0x1c   : > { %335 = vmatpush.msra.mxu0 %v322_v8  ;;  %v476_v61 = vor.u32 1.1754944e-38, %v475_v57  ;;  %vm474_vm12 = vcmp.eq.f32.partialorder %v473_v59, 8.507059e+37 }
  0x1e   : > { %336 = vmatpush.msra.mxu0 %v321_v9 }
  0x20   : > { %337 = vmatpush.msra.mxu0 %v320_v10 }
  0x22   : > { %338 = vmatpush.msra.mxu0 %v319_v11 }
  0x24   : > { %339 = vmatpush.msra.mxu0 %v318_v12 }
  0x26   : > { %340 = vmatpush.msra.mxu0 %v317_v13 }
  0x28   : > { %341 = vmatpush.msra.mxu0 %v316_v14 }
  0x2a   : > { %342 = vmatpush.msra.mxu0 %v315_v15 }
  0x2c   : > { %343 = vmatpush.msra.mxu0 %v314_v16 }
  0x2e   : > { %344 = vmatpush.msra.mxu0 %v313_v17 }
  0x2f   : > { %345 = vmatmul.f32.vlgmr.msra.gmra.mxu0 %v312_v18 }
  0x88   : > { %v379_v28 = vpop.permute.xlu1 %378 }
  0x89   : > { %vm381_vm6 = vcmp.eq.s32.totalorder %v379_v28, %v660_v27 }
  0x8a   : > { %vm382_vm8 = vmand %vm381_vm6, %vm813_vm7 }
  0xac   : > { %v346_v30 = vpop.f32.mrf.mxu0 }
  0xad   : > { %v374_v31 = vsel %vm813_vm7, %v346_v30, -1e+30 }
  0xae   : > { %384 = vmax.xlane.f32.xlu0 %v374_v31  ;;  %v408_v32 = vsel %vm382_vm8, %v374_v31, 0.0 }
  0xaf   : > { %409 = vadd.xlane.f32.xlu2 %v408_v32 }
 0x121   : > { %v385_v36 = vpop.xlane.xlu0 %384 }
 0x122   : > { %v386_v37 = vmax.f32 %v383_v34, %v385_v36  ;;  %v410_v38 = vpop.xlane.xlu2 %409 }
 0x123   : > { %v411_v39 = vadd.f32 %v410_v38, %v407_v35 }
 0x124   : > { %v396_v40 = vsub.f32 %v383_v34, %v386_v37  ;;  %406 = vst.msk [vmem:[#allocation2] sm:$0xff] %vm308_vm3, %v386_v37  ;;  %389 = vperm.xlu0 %658, %v386_v37  }
 0x125   : > { %412 = vst.msk [vmem:[#allocation4] sm:$0xff] %vm308_vm3, %v411_v39 }
 0x126   : > { %v397_v47 = vmul.f32 1.442695, %v396_v40 }
 0x12b   : > { %v455_v3 = vld [vmem:[#allocation2] sm:$0xff] }
 0x12c   : > { %v463_v1 = vld [vmem:[#allocation4] sm:$0xff] }
 0x196   : > { %v390_v41 = vpop.permute.xlu0 %389 }
 0x197   : > { %v392_v42 = vsub.f32 %v374_v31, %v390_v41 }
 0x199   : > { %v393_v43 = vmul.f32 1.442695, %v392_v42 }
 0x19b   : > { %661 = vpow2.f32 %v393_v43 }
 0x19c   : > { %663 = vrcp.f32 %v462_v46 }
 0x19d   : > { %665 = vpow2.f32 %v397_v47 }
 0x1a1   : > { %v662_v44 = vpop.eup %661 }
 0x1a2   : > { %v395_v45 = vsel %vm813_vm7, %v662_v44, 0.0  ;;  %v664_v48 = vpop.eup %663 }
 0x1a3   : > { %401 = vadd.xlane.f32.xlu1 %v395_v45  ;;  %v666_v49 = vpop.eup %665  ;;  %v465_v51 = vmul.f32 %v664_v48, %v462_v46  ;;  %vm470_vm10 = vweird.f32 %v664_v48 }
 0x1a4   : > { %v400_v52 = vmul.f32 %v666_v49, %v399_v50  ;;  %vm471_vm11 = vmor %vm469_vm9, %vm470_vm10 }
 0x1a5   : > { %v466_v55 = vsub.f32 1.0, %v465_v51 }
 0x1a7   : > { %v467_v56 = vmul.f32 %v664_v48, %v466_v55 }
 0x1a9   : > { %v468_v58 = vadd.f32 %v664_v48, %v467_v56 }
 0x1ab   : > { %v472_v62 = vsel %vm471_vm11, %v664_v48, %v468_v58 }
 0x1ac   : > { %v477_v0 = vsel %vm474_vm12, %v476_v61, %v472_v62 }
 0x1ad   : > { %v478_v4 = vmul.f32 %v477_v0, %v463_v1 }
 0x216   : > { %v402_v53 = vpop.xlane.xlu1 %401 }
 0x217   : > { %v403_v54 = vadd.f32 %v402_v53, %v400_v52 }
 0x219   : > { %405 = vst.msk [vmem:[#allocation3] sm:$0xff] %vm308_vm3, %v403_v54 }
 0x220   : > { %v456_v60 = vld [vmem:[#allocation3] sm:$0xff] }
 0x221   : > { %667 = vlog2.f32 %v456_v60 }
 0x227   : > { %v668_v63 = vpop.eup %667 }
 0x228   : > { %v458_v2 = vmul.f32 0.6931472, %v668_v63 }
 0x22a   : > { %v459_v5 = vadd.f32 %v458_v2, %v455_v3 }
 0x22c   : > { %v479_v6 = vsub.f32 %v478_v4, %v459_v5 }
 0x22e   : > { %v486_v7 = vmul.f32 -1.0, %v479_v6 }
 0x230   : > { %v487_v8 = vsel %vm805_vm2, %v486_v7, 0.0 }
 0x231   : > { %489 = vst.msk [vmem:[%s303_s24] sm:$0xff] %vm308_vm3, %v487_v8 }
 0x232 PF: > { %s16_s20 = sadd.s32 1, %s725_s20   ;;  %s855_s18 = smov %s721_s19 }
 0x233   : > { %p13_p8 = scmp.ge.s32.totalorder %s16_s20, 4   ;;  %s856_s19 = smov %s858_s22 }
 0x235   :  { %15 = sbr.rel (!%p13_p8) target bundleno = 2 (0x2), region = 101 }
 0x23a   :  { %509 = vsyncpa [#allocation6], 1 }
 0x23b   :  { %511 = vsyncpa [#allocation6 + $0x1], 1 }

</bundles_post_ra>
